<compile_context>
chip_gen: v6e
topology: v6e:2x2x1
jax: 0.10.0
libtpu: 0.0.40
codegen_flags: <defaults>
</compile_context>

<pallas_src>
import functools

import jax
import jax.numpy as jnp
from jax.experimental import pallas as pl
from jax.experimental.pallas import tpu as pltpu


def _round_up(x, m):
    return ((x + m - 1) // m) * m


def _pick_tile_rows(n_rows, row_bytes, sublane):
    """Rows per grid step: sublane multiple, VMEM-friendly, >=2 grid steps when possible."""
    if n_rows <= sublane:
        return n_rows                                   # single block == whole (tiny) array
    # ~4 MiB per output tile keeps the double-buffered pipeline well inside every
    # scoped-VMEM default (v5e 16 MiB, v6e/v7x 32 MiB).
    cap = max(sublane, ((4 << 20) // max(row_bytes, 1)) // sublane * sublane)
    tile = min(1024, cap)
    # Split the rows across at least 2 grid steps so both v7x TensorCores get work.
    two_way = _round_up((n_rows + 1) // 2, sublane)
    return max(sublane, min(tile, two_way))


def _pos_emb_kernel(x_ref, freq_ref, out_ref, *, group, half, split_store):
    # x_ref: (tile_rows, group) f32, freq_ref: (1, half) f32,
    # out_ref: (tile_rows, group * num_channels) out_dtype.
    x = x_ref[...]
    freq = freq_ref[...]

    if split_store:
        # group == 1 and half % 128 == 0: two 128-aligned, unmasked stores.
        phase = x * freq                                  # (tile_rows, half)
        out_ref[:, :half] = jnp.cos(phase).astype(out_ref.dtype)
        out_ref[:, half:] = jnp.sin(phase).astype(out_ref.dtype)
        return

    pieces = []
    for g in range(group):                                # group <= 8, unrolled at trace time
        phase = x[:, g:g + 1] * freq                      # VPU broadcast outer product
        pieces.append(jnp.cos(phase))
        pieces.append(jnp.sin(phase))                     # exact sin (no shift trick)
    out_ref[...] = jnp.concatenate(pieces, axis=-1).astype(out_ref.dtype)


def positional_embedding(x, num_channels, max_positions=10000, endpoint=False,
                         out_dtype=jnp.float32):
    """x: (N,) positions/timesteps. Returns (N, num_channels) in out_dtype."""
    assert x.ndim == 1
    assert num_channels % 2 == 0, "num_channels must be even"
    half = num_channels // 2
    if endpoint:
        assert half > 1, "endpoint=True requires num_channels // 2 > 1"
    out_dtype = jnp.dtype(out_dtype)

    n = x.shape[0]
    if n == 0:
        return jnp.zeros((0, num_channels), out_dtype)

    # Pick a group factor G so the stored row width G*C is a multiple of 128
    # (lane-dense, unmasked vst) and the packed <-> (N, C) reshape stays free.
    group = 1
    for g in range(1, 9):
        if (g * num_channels) % 128 == 0 and n % g == 0:
            group = g
            break
    n_rows = n // group
    width = group * num_channels
    split_store = (group == 1) and (half % 128 == 0)

    x2d = x.astype(jnp.float32).reshape(n_rows, group)

    # Hoisted constant frequency row (computed once, DMA'd once via constant index_map).
    freqs = jnp.arange(half, dtype=jnp.float32) / jnp.float32(
        half - (1 if endpoint else 0))
    freq_row = jnp.power(jnp.float32(1.0 / max_positions), freqs).reshape(1, half)

    sublane = 8 if out_dtype.itemsize >= 4 else 32 // out_dtype.itemsize
    tile_rows = _pick_tile_rows(n_rows, width * out_dtype.itemsize, sublane)
    grid = (pl.cdiv(n_rows, tile_rows),)

    kernel = functools.partial(_pos_emb_kernel, group=group, half=half,
                               split_store=split_store)
    out_packed = pl.pallas_call(
        kernel,
        out_shape=jax.ShapeDtypeStruct((n_rows, width), out_dtype),
        grid=grid,
        in_specs=[
            pl.BlockSpec((tile_rows, group), lambda i: (i, 0)),
            pl.BlockSpec((1, half), lambda i: (0, 0)),
        ],
        out_specs=pl.BlockSpec((tile_rows, width), lambda i: (i, 0)),
        compiler_params=pltpu.CompilerParams(dimension_semantics=("parallel",)),
    )(x2d, freq_row)

    return out_packed.reshape(n, num_channels)


def _reference(x, num_channels, max_positions=10000, endpoint=False):
    half = num_channels // 2
    freqs = jnp.arange(half, dtype=jnp.float32)
    freqs = freqs / (half - (1 if endpoint else 0))
    freqs = (1.0 / max_positions) ** freqs
    phase = jnp.outer(x.astype(jnp.float32), freqs)
    return jnp.concatenate([jnp.cos(phase), jnp.sin(phase)], axis=1)


if __name__ == "__main__":
    key = jax.random.PRNGKey(0)
    k1, k2, k3 = jax.random.split(key, 3)

    # Case 1: tiny batch, small channels -> lane-dense grouped path (G=4), single block.
    n1, c1 = 8, 32
    x1 = jax.random.uniform(k1, (n1,), dtype=jnp.float32) * 1000.0
    out1 = jax.block_until_ready(positional_embedding(x1, c1))
    assert out1.shape == (n1, c1)
    assert jnp.allclose(out1, _reference(x1, c1), atol=1e-4, rtol=1e-4)

    # Case 2: grouped path (G=2) with a 2-step grid and a ragged (masked) last tile.
    n2, c2 = 300, 64
    x2 = jax.random.uniform(k2, (n2,), dtype=jnp.float32) * 1000.0
    out2 = jax.block_until_ready(positional_embedding(x2, c2, endpoint=True))
    assert out2.shape == (n2, c2)
    assert jnp.allclose(out2, _reference(x2, c2, endpoint=True), atol=1e-4, rtol=1e-4)

    # Case 3: C = 256 -> ungrouped half-width phase, two 128-aligned unmasked stores,
    # ragged 2-step grid.
    n3, c3 = 20, 256
    x3 = jax.random.uniform(k3, (n3,), dtype=jnp.float32) * 1000.0
    out3 = jax.block_until_ready(positional_embedding(x3, c3))
    assert out3.shape == (n3, c3)
    assert jnp.allclose(out3, _reference(x3, c3), atol=1e-4, rtol=1e-4)

    print("KERNEL_OK")
</pallas_src>

<mosaic_0001>
module attributes {stable_mosaic.version = 11 : i64} {
  func.func @_pos_emb_kernel(%arg0: i32, %arg1: memref<2x4xf32, #tpu.memory_space<vmem>>, %arg2: memref<1x16xf32, #tpu.memory_space<vmem>>, %arg3: memref<2x128xf32, #tpu.memory_space<vmem>>) attributes {dimension_semantics = [#tpu.dimension_semantics<parallel>], iteration_bounds = array<i64: 1>, scalar_prefetch = 0 : i64, scratch_operands = 0 : i64, tpu.core_type = #tpu.core_type<tc>, window_params = [{transform_indices = @transform_0, window_bounds = array<i64: 2, 4>}, {pipeline_mode = #tpu.pipeline_mode<synchronous>, transform_indices = @transform_1, window_bounds = array<i64: 1, 16>}, {transform_indices = @transform_2, window_bounds = array<i64: 2, 128>}]} {
    %c0 = arith.constant 0 : index
    %c0_0 = arith.constant 0 : index
    %0 = vector.load %arg1[%c0, %c0_0] : memref<2x4xf32, #tpu.memory_space<vmem>>, vector<2x4xf32>
    %c0_1 = arith.constant 0 : index
    %c0_2 = arith.constant 0 : index
    %1 = vector.load %arg2[%c0_1, %c0_2] : memref<1x16xf32, #tpu.memory_space<vmem>>, vector<1x16xf32>
    %2 = vector.extract_strided_slice %0 {offsets = [0, 0], sizes = [2, 1], strides = [1, 1]} : vector<2x4xf32> to vector<2x1xf32>
    %3 = vector.broadcast %2 : vector<2x1xf32> to vector<2x16xf32>
    %4 = vector.broadcast %1 : vector<1x16xf32> to vector<2x16xf32>
    %5 = arith.mulf %3, %4 : vector<2x16xf32>
    %6 = math.cos %5 : vector<2x16xf32>
    %7 = math.sin %5 : vector<2x16xf32>
    %8 = vector.extract_strided_slice %0 {offsets = [0, 1], sizes = [2, 1], strides = [1, 1]} : vector<2x4xf32> to vector<2x1xf32>
    %9 = vector.broadcast %8 : vector<2x1xf32> to vector<2x16xf32>
    %10 = vector.broadcast %1 : vector<1x16xf32> to vector<2x16xf32>
    %11 = arith.mulf %9, %10 : vector<2x16xf32>
    %12 = math.cos %11 : vector<2x16xf32>
    %13 = math.sin %11 : vector<2x16xf32>
    %14 = vector.extract_strided_slice %0 {offsets = [0, 2], sizes = [2, 1], strides = [1, 1]} : vector<2x4xf32> to vector<2x1xf32>
    %15 = vector.broadcast %14 : vector<2x1xf32> to vector<2x16xf32>
    %16 = vector.broadcast %1 : vector<1x16xf32> to vector<2x16xf32>
    %17 = arith.mulf %15, %16 : vector<2x16xf32>
    %18 = math.cos %17 : vector<2x16xf32>
    %19 = math.sin %17 : vector<2x16xf32>
    %20 = vector.extract_strided_slice %0 {offsets = [0, 3], sizes = [2, 1], strides = [1, 1]} : vector<2x4xf32> to vector<2x1xf32>
    %21 = vector.broadcast %20 : vector<2x1xf32> to vector<2x16xf32>
    %22 = vector.broadcast %1 : vector<1x16xf32> to vector<2x16xf32>
    %23 = arith.mulf %21, %22 : vector<2x16xf32>
    %24 = math.cos %23 : vector<2x16xf32>
    %25 = math.sin %23 : vector<2x16xf32>
    %26 = tpu.concatenate %6, %7, %12, %13, %18, %19, %24, %25 in 1 : vector<2x16xf32>, vector<2x16xf32>, vector<2x16xf32>, vector<2x16xf32>, vector<2x16xf32>, vector<2x16xf32>, vector<2x16xf32>, vector<2x16xf32> -> vector<2x128xf32>
    %c0_3 = arith.constant 0 : index
    %c0_4 = arith.constant 0 : index
    %27 = vector.load %arg3[%c0_3, %c0_4] : memref<2x128xf32, #tpu.memory_space<vmem>>, vector<2x128xf32>
    tpu.vector_store %arg3[%c0_3, %c0_4], %26 {strides = array<i32>} : memref<2x128xf32, #tpu.memory_space<vmem>>, vector<2x128xf32>,
    return
  }
  func.func @transform_0(%arg0: i32) -> (i32, i32) {
    %c0_i32 = arith.constant 0 : i32
    %c0_i32_0 = arith.constant 0 : i32
    return %arg0, %c0_i32 : i32, i32
  }
  func.func @transform_1(%arg0: i32) -> (i32, i32) {
    %c0_i32 = arith.constant 0 : i32
    %c0_i32_0 = arith.constant 0 : i32
    %c0_i32_1 = arith.constant 0 : i32
    return %c0_i32, %c0_i32_0 : i32, i32
  }
  func.func @transform_2(%arg0: i32) -> (i32, i32) {
    %c0_i32 = arith.constant 0 : i32
    %c0_i32_0 = arith.constant 0 : i32
    return %arg0, %c0_i32 : i32, i32
  }
}

</mosaic_0001>

<bundles_post_ra>
// kernel: tpu_custom_call.1
= control target key start
LH: loop header
LB: loop body
LE: loop exit
PB: predicated region body
PF: predicated region fallthrough
CT: control target
= control target key end

     0   :  { %7 = vsyncpa [#allocation3], 0  ;;  %s1402_s0 = inlined_call_operand.hbm [shape: f32[2,4], index: 0, kind: input, shape index: {}]   ;;  %s1403_s1 = inlined_call_operand.vmem [shape: f32[1,16], index: 1, kind: input, shape index: {}]   ;;  %s1404_s2 = inlined_call_operand.hbm [shape: f32[2,128], index: 2, kind: output, shape index: {}]  }
   0x1   :  { %8 = vsyncpa [#allocation4], 0  ;;  %s1072_s9 = smov [#allocation2]  }
   0x2   :  { %s15_s10 = sshll.u32 %s1072_s9, 4  ;;  %s16_s10 = int_to_ptr.vmem [resolvable:$true] %s15_s10 }
   0x3   :  { %s1036_s11 = scalar_lea.vmem %s16_s10, 32  ;;  %p1041_p1 = scmp.lt.s32.totalorder %s16_s10, %s16_s10 }
   0x4   :  { %p1037_p0 = scmp.ne.s32.totalorder %s16_s10, %s1036_s11  ;;  %p1042_p2 = scmp.lt.s32.totalorder %s1036_s11, %s1036_s11 }
   0x6   :  { %p1043_p3 = por %p1042_p2, %p1041_p1 }
   0x8   :  { %p1044_p4 = pnand %p1043_p3, %p1037_p0 }
   0xa   :  { %1047 = shalt.err (!%p1044_p4)
}
   0xb   :  { %18 = dma.hbm_to_vmem [thread:$0]  %s1402_s0, 32, %s16_s10, [#allocation3]  }
   0xc   :  { %1068 = dma.done.wait [#allocation3], 32  }
   0xd   :  { %1069 = vsyncadd [#allocation3], 4294967264  ;;  %v1073_v0 = vmov 2   ;;  %v1074_v1 = vmov 0   ;;  %v24_v2 = vld [vmem:[#allocation2] sm:$0x3] }
   0xe   :  { %1009 = vset.pattern.permute.xlu1 %v1073_v0  ;;  %1007 = vset.pattern.permute.xlu0 %v1074_v1  ;;  %v1075_v3 = vmov 3   ;;  %v1076_v4 = vmov 1   ;;  %v939_v5 = vld [vmem:[%s1403_s1] ss:$0 sm:$0xff]  ;;  %v1077_v42 = vmov 683565275  }
   0xf   :  { %458 = vperm.xlu1 %1009, %v24_v2   ;;  %28 = vperm.xlu0 %1007, %v24_v2   ;;  %v1078_v44 = vmov 2475754826   ;;  %v1079_v46 = vmov 2131351028   ;;  %v1080_v48 = vmov 2102212464  }
  0x10   :  { %v1081_v50 = vmov 920167782   ;;  %v1082_v58 = vmov 1326507024   ;;  %s1083_s0 = smov 16   ;;  %s1084_s1 = smov 48  }
  0x11   :  { %s1085_s16 = smov 32   ;;  %s1086_s17 = smov 80  }
  0x12   :  { %s1087_s18 = smov 64   ;;  %s1088_s19 = smov 112  }
  0x13   :  { %1010 = vset.pattern.permute.xlu1 %v1075_v3  ;;  %1008 = vset.pattern.permute.xlu0 %v1076_v4  ;;  %s1089_s20 = smov 96   ;;  %s1090_s21 = smov [#allocation5]  }
  0x14   :  { %670 = vperm.xlu1 %1010, %v24_v2   ;;  %246 = vperm.xlu0 %1008, %v24_v2   ;;  %s930_s22 = sshll.u32 %s1090_s21, 4  ;;  %s931_s22 = int_to_ptr.vmem [resolvable:$true] %s930_s22 }
  0x15   :  { %s1048_s23 = scalar_lea.vmem %s931_s22, 32  ;;  %p1053_p6 = scmp.lt.s32.totalorder %s931_s22, %s931_s22 }
  0x16   :  { %p1049_p5 = scmp.ne.s32.totalorder %s931_s22, %s1048_s23  ;;  %p1054_p7 = scmp.lt.s32.totalorder %s1048_s23, %s1048_s23 }
  0x18   :  { %1011 = vset.pattern.permute.xlu0 %v1075_v3  ;;  %p1055_p8 = por %p1054_p7, %p1053_p6 }
  0x1a   :  { %p1056_p9 = pnand %p1055_p8, %p1049_p5 }
  0x8a   :  { %v459_v6 = vpop.permute.xlu1 %458  ;;  %v29_v7 = vpop.permute.xlu0 %28 }
  0x8b   :  { %v1112_v8 = vmul.f32 %v939_v5, %v459_v6  ;;  %v1114_v9 = vmul.f32 %v939_v5, %v29_v7 }
  0x8d   :  { %v462_v10 = vand.u32 2147483647, %v1112_v8  ;;  %v465_v11 = vand.u32 2139095040, %v1112_v8  ;;  %v38_v12 = vand.u32 2147483647, %v1114_v9  ;;  %v41_v13 = vand.u32 2139095040, %v1114_v9 }
  0x8f   :  { %v466_v14 = vshrl.u32 %v465_v11, 23  ;;  %v469_v15 = vand.u32 8388607, %v462_v10  ;;  %v45_v16 = vand.u32 8388607, %v38_v12  ;;  %v671_v17 = vpop.permute.xlu1 %670  ;;  %v42_v18 = vshrl.u32 %v41_v13, 23  ;;  %v247_v21 = vpop.permute.xlu0 %246 }
  0x90   :  { %v1124_v19 = vmul.f32 %v939_v5, %v671_v17  ;;  %v1128_v30 = vmul.f32 %v939_v5, %v247_v21 }
  0x91   :  { %v956_v20 = vadd.s32 4294967169, %v466_v14  ;;  %v470_v22 = vor.u32 8388608, %v469_v15  ;;  %v940_v23 = vadd.s32 4294967169, %v42_v18  ;;  %v46_v26 = vor.u32 8388608, %v45_v16 }
  0x92   :  { %v677_v24 = vand.u32 2139095040, %v1124_v19  ;;  %v674_v28 = vand.u32 2147483647, %v1124_v19  ;;  %v253_v40 = vand.u32 2139095040, %v1128_v30 }
  0x93   :  { %v472_v25 = vadd.s32 1, %v956_v20  ;;  %v48_v27 = vadd.s32 1, %v940_v23  ;;  %v1130_v32 = vshll.u32 %v470_v22, 8  ;;  %v1132_v36 = vshll.u32 %v46_v26, 8 }
  0x94   :  { %v678_v29 = vshrl.u32 %v677_v24, 23  ;;  %v1138_v39 = vand.u32 8388607, %v674_v28 }
  0x95   :  { %vm473_vm0 = vcmp.gt.s32.totalorder %v472_v25, 0  ;;  %vm49_vm1 = vcmp.gt.s32.totalorder %v48_v27, 0 }
  0x96   :  { %v474_v31 = vsel %vm473_vm0, %v472_v25, 0  ;;  %v50_v35 = vsel %vm49_vm1, %v48_v27, 0  ;;  %v964_v38 = vadd.s32 4294967169, %v678_v29 }
  0x97   :  { %v475_v33 = vshrl.u32 %v474_v31, 5  ;;  %v476_v34 = vand.u32 31, %v474_v31  ;;  %v1134_v37 = vand.u32 31, %v50_v35  ;;  %v1146_v52 = vshrl.u32 %v50_v35, 5 }
  0x98   :  { %v684_v2 = vadd.s32 1, %v964_v38 }
  0x99   :  { %v477_v41 = vsub.s32 32, %v476_v34  ;;  %v479_v43 = vshll.u32 %v1077_v42, %v476_v34  ;;  %v482_v45 = vshll.u32 %v1078_v44, %v476_v34  ;;  %v485_v47 = vshll.u32 %v1079_v46, %v476_v34 }
  0x9a   :  { %v488_v49 = vshll.u32 %v1080_v48, %v476_v34  ;;  %v491_v51 = vshll.u32 %v1081_v50, %v476_v34  ;;  %vm494_vm2 = vcmp.lt.s32.totalorder %v475_v33, 1  ;;  %vm496_vm3 = vcmp.lt.s32.totalorder %v475_v33, 3 }
  0x9b   :  { %v478_v53 = vshrl.u32 %v1077_v42, %v477_v41  ;;  %v480_v54 = vshrl.u32 %v1078_v44, %v477_v41  ;;  %v483_v55 = vshrl.u32 %v1079_v46, %v477_v41  ;;  %v486_v56 = vshrl.u32 %v1080_v48, %v477_v41 }
  0x9c   :  { %v489_v57 = vshrl.u32 %v1081_v50, %v477_v41  ;;  %v492_v59 = vshrl.u32 %v1082_v58, %v477_v41  ;;  %vm497_vm4 = vcmp.lt.s32.totalorder %v475_v33, 4  ;;  %v53_v63 = vsub.s32 32, %v1134_v37 }
  0x9d   :  { %v481_v60 = vor.u32 %v480_v54, %v479_v43  ;;  %v484_v61 = vor.u32 %v483_v55, %v482_v45  ;;  %v487_v62 = vor.u32 %v486_v56, %v485_v47  ;;  %vm495_vm5 = vcmp.lt.s32.totalorder %v475_v33, 2 }
  0x9e   :  { %v490_v0 = vor.u32 %v489_v57, %v488_v49  ;;  %v493_v1 = vor.u32 %v492_v59, %v491_v51  ;;  %v55_v14 = vshll.u32 %v1077_v42, %v1134_v37  ;;  %v56_v17 = vshrl.u32 %v1078_v44, %v53_v63 }
  0x9f   :  { %v498_v3 = vsel %vm494_vm2, %v478_v53, %v481_v60  ;;  %v499_v4 = vsel %vm497_vm4, %v487_v62, 2102212464  ;;  %v502_v5 = vsel %vm494_vm2, %v481_v60, %v484_v61  ;;  %v506_v6 = vsel %vm494_vm2, %v484_v61, %v487_v62 }
  0xa0   :  { %v500_v7 = vsel %vm496_vm3, %v484_v61, %v499_v4  ;;  %v503_v11 = vsel %vm497_vm4, %v490_v0, 920167782  ;;  %v507_v13 = vsel %vm497_vm4, %v493_v1, 1326507024  ;;  %v58_v18 = vshll.u32 %v1078_v44, %v1134_v37 }
  0xa1   :  { %v504_v15 = vsel %vm496_vm3, %v487_v62, %v503_v11  ;;  %v508_v16 = vsel %vm496_vm3, %v490_v0, %v507_v13  ;;  %v501_v20 = vsel %vm495_vm5, %v498_v3, %v500_v7  ;;  %v59_v23 = vshrl.u32 %v1079_v46, %v53_v63 }
  0xa2   :  { %v505_v21 = vsel %vm495_vm5, %v502_v5, %v504_v15  ;;  %v509_v22 = vsel %vm495_vm5, %v506_v6, %v508_v16  ;;  %v57_v29 = vor.u32 %v56_v17, %v55_v14  ;;  %v61_v34 = vshll.u32 %v1079_v46, %v1134_v37 }
  0xa3   :  { %v1171_v24 = vmul.u32.u64.low %v1130_v32, %v509_v22  ;;  %v1172_v25 = vmul.u32.u64.high %v1130_v32, %v509_v22, %v1171_v24  ;;  %v1175_v26 = vmul.u32.u64.low %v1130_v32, %v505_v21  ;;  %v1176_v27 = vmul.u32.u64.high %v1130_v32, %v505_v21, %v1175_v26 }
  0xa4   :  { %v60_v31 = vor.u32 %v59_v23, %v58_v18  ;;  %v62_v35 = vshrl.u32 %v1080_v48, %v53_v63  ;;  %v54_v33 = vshrl.u32 %v1077_v42, %v53_v63  ;;  %v64_v38 = vshll.u32 %v1080_v48, %v1134_v37 }
  0xa5   :  { %v65_v41 = vshrl.u32 %v1081_v50, %v53_v63  ;;  %v68_v43 = vshrl.u32 %v1082_v58, %v53_v63  ;;  %v517_v45 = vmul.u32 %v1130_v32, %v501_v20  ;;  %v67_v49 = vshll.u32 %v1081_v50, %v1134_v37 }
  0xa6   :  { %v63_v47 = vor.u32 %v62_v35, %v61_v34  ;;  %vm70_vm6 = vcmp.lt.s32.totalorder %v1146_v52, 1  ;;  %vm519_vm7 = vc.u32 %v1172_v25, %v1175_v26  ;;  %v520_v51 = vadd.s32 1, %v1176_v27 }
  0xa7   :  { %v66_v53 = vor.u32 %v65_v41, %v64_v38  ;;  %vm71_vm8 = vcmp.lt.s32.totalorder %v1146_v52, 2  ;;  %v69_v54 = vor.u32 %v68_v43, %v67_v49  ;;  %vm72_vm9 = vcmp.lt.s32.totalorder %v1146_v52, 3 }
  0xa8   :  { %vm73_vm10 = vcmp.lt.s32.totalorder %v1146_v52, 4  ;;  %v78_v32 = vsel %vm70_vm6, %v57_v29, %v60_v31  ;;  %v521_v55 = vsel %vm519_vm7, %v520_v51, %v1176_v27  ;;  %v82_v57 = vsel %vm70_vm6, %v60_v31, %v63_v47 }
  0xa9   :  { %v75_v56 = vsel %vm73_vm10, %v63_v47, 2102212464  ;;  %v79_v37 = vsel %vm73_vm10, %v66_v53, 920167782  ;;  %v522_v59 = vadd.s32 %v521_v55, %v517_v45  ;;  %v74_v60 = vsel %vm70_vm6, %v54_v33, %v57_v29 }
  0xaa   :  { %v80_v61 = vsel %vm72_vm9, %v63_v47, %v79_v37  ;;  %v83_v62 = vsel %vm73_vm10, %v69_v54, 1326507024  ;;  %v76_v63 = vsel %vm72_vm9, %v60_v31, %v75_v56  ;;  %vm685_vm11 = vcmp.gt.s32.totalorder %v684_v2, 0 }
  0xab   :  { %v81_v0 = vsel %vm71_vm8, %v78_v32, %v80_v61  ;;  %v84_v1 = vsel %vm72_vm9, %v66_v53, %v83_v62  ;;  %v523_v3 = vadd.s32 536870912, %v522_v59  ;;  %v686_v13 = vsel %vm685_vm11, %v684_v2, 0 }
  0xac   :  { %v85_v4 = vsel %vm71_vm8, %v82_v57, %v84_v1  ;;  %v1203_v5 = vmul.u32.u64.low %v1132_v36, %v81_v0  ;;  %v1204_v6 = vmul.u32.u64.high %v1132_v36, %v81_v0, %v1203_v5  ;;  %v77_v15 = vsel %vm71_vm8, %v74_v60, %v76_v63 }
  0xad   :  { %v1208_v7 = vmul.u32.u64.low %v1132_v36, %v85_v4  ;;  %v1209_v11 = vmul.u32.u64.high %v1132_v36, %v85_v4, %v1208_v7  ;;  %v1211_v14 = vshrl.u32 %v523_v3, 30  ;;  %v688_v16 = vand.u32 31, %v686_v13 }
  0xae   :  { %v682_v17 = vor.u32 8388608, %v1138_v39  ;;  %v250_v18 = vand.u32 2147483647, %v1128_v30  ;;  %v254_v20 = vshrl.u32 %v253_v40, 23  ;;  %v96_v22 = vadd.s32 1, %v1204_v6 }
  0xaf   :  { %v525_v21 = vshll.u32 %v1211_v14, 30  ;;  %v689_v23 = vsub.s32 32, %v688_v16  ;;  %v691_v2 = vshll.u32 %v1077_v42, %v688_v16  ;;  %v93_v24 = vmul.u32 %v1132_v36, %v77_v15 }
  0xb0   :  { %vm95_vm12 = vc.u32 %v1209_v11, %v1203_v5  ;;  %v694_v52 = vshll.u32 %v1078_v44, %v688_v16  ;;  %v697_v39 = vshll.u32 %v1079_v46, %v688_v16  ;;  %v687_v29 = vshrl.u32 %v686_v13, 5 }
  0xb1   :  { %v1227_v27 = vsub.s32 %v522_v59, %v525_v21  ;;  %v97_v40 = vsel %vm95_vm12, %v96_v22, %v1204_v6  ;;  %v692_v31 = vshrl.u32 %v1078_v44, %v689_v23  ;;  %v695_v35 = vshrl.u32 %v1079_v46, %v689_v23 }
  0xb2   :  { %v98_v34 = vadd.s32 %v97_v40, %v93_v24  ;;  %v698_v33 = vshrl.u32 %v1080_v48, %v689_v23  ;;  %v700_v36 = vshll.u32 %v1080_v48, %v688_v16  ;;  %v701_v43 = vshrl.u32 %v1081_v50, %v689_v23 }
  0xb3   :  { %v528_v38 = vsub.s32 0, %v1227_v27  ;;  %v693_v41 = vor.u32 %v692_v31, %v691_v2  ;;  %v703_v45 = vshll.u32 %v1081_v50, %v688_v16  ;;  %v696_v49 = vor.u32 %v695_v35, %v694_v52 }
  0xb4   :  { %v99_v47 = vadd.s32 536870912, %v98_v34  ;;  %v699_v51 = vor.u32 %v698_v33, %v697_v39  ;;  %v704_v53 = vshrl.u32 %v1082_v58, %v689_v23  ;;  %v690_v32 = vshrl.u32 %v1077_v42, %v689_v23 }
  0xb5   :  { %v957_v54 = vmin.u32 %v528_v38, %v1227_v27  ;;  %v702_v55 = vor.u32 %v701_v43, %v700_v36  ;;  %vm706_vm13 = vcmp.lt.s32.totalorder %v687_v29, 1  ;;  %vm708_vm14 = vcmp.lt.s32.totalorder %v687_v29, 3 }
  0xb6   :  { %v1240_v56 = vshrl.u32 %v99_v47, 30  ;;  %v705_v37 = vor.u32 %v704_v53, %v703_v45  ;;  %vm709_vm15 = vcmp.lt.s32.totalorder %v687_v29, 4  ;;  %vm707_vm0 = vcmp.lt.s32.totalorder %v687_v29, 2 }
  0xb7   :  { %v530_v57 = vclz %v957_v54  ;;  %v711_v59 = vsel %vm709_vm15, %v699_v51, 2102212464  ;;  %v714_v60 = vsel %vm706_vm13, %v693_v41, %v696_v49  ;;  %v715_v62 = vsel %vm709_vm15, %v702_v55, 920167782 }
  0xb8   :  { %v101_v61 = vshll.u32 %v1240_v56, 30  ;;  %v718_v63 = vsel %vm706_vm13, %v696_v49, %v699_v51  ;;  %v722_v0 = vshll.u32 %v682_v17, 8  ;;  %v710_v1 = vsel %vm706_vm13, %v690_v32, %v693_v41 }
  0xb9   :  { %v716_v3 = vsel %vm708_vm14, %v699_v51, %v715_v62  ;;  %v719_v4 = vsel %vm709_vm15, %v705_v37, 1326507024  ;;  %v948_v6 = vadd.s32 4294967169, %v254_v20  ;;  %v712_v13 = vsel %vm708_vm14, %v696_v49, %v711_v59 }
  0xba   :  { %v102_v7 = vsub.s32 %v98_v34, %v101_v61  ;;  %v717_v15 = vsel %vm707_vm0, %v714_v60, %v716_v3  ;;  %v720_v16 = vsel %vm708_vm14, %v702_v55, %v719_v4  ;;  %v958_v21 = vadd.s32 4294967294, %v530_v57 }
  0xbb   :  { %v721_v22 = vsel %vm707_vm0, %v718_v63, %v720_v16  ;;  %v1248_v23 = vmul.u32.u64.low %v722_v0, %v717_v15  ;;  %v1249_v2 = vmul.u32.u64.high %v722_v0, %v717_v15, %v1248_v23  ;;  %v713_v20 = vsel %vm707_vm0, %v710_v1, %v712_v13 }
  0xbc   :  { %v104_v17 = vsub.s32 0, %v102_v7  ;;  %v1252_v24 = vmul.u32.u64.low %v722_v0, %v721_v22  ;;  %v1253_v52 = vmul.u32.u64.high %v722_v0, %v721_v22, %v1252_v24  ;;  %v260_v39 = vadd.s32 1, %v948_v6 }
  0xbd   :  { %vm959_vm1 = vcmp.lt.s32.totalorder %v958_v21, 0  ;;  %v732_v31 = vadd.s32 1, %v1249_v2  ;;  %v257_v34 = vand.u32 8388607, %v250_v18  ;;  %v729_v33 = vmul.u32 %v722_v0, %v713_v20 }
  0xbe   :  { %v941_v40 = vmin.u32 %v104_v17, %v102_v7  ;;  %vm261_vm2 = vcmp.gt.s32.totalorder %v260_v39, 0  ;;  %vm731_vm3 = vc.u32 %v1253_v52, %v1248_v23  ;;  %v1262_v41 = vsel %vm959_vm1, 0, %v958_v21 }
  0xbf   :  { %v262_v36 = vsel %vm261_vm2, %v260_v39, 0  ;;  %v733_v38 = vsel %vm731_vm3, %v732_v31, %v1249_v2  ;;  %v258_v49 = vor.u32 8388608, %v257_v34  ;;  %v538_v53 = vsub.s32 4294967266, %v1262_v41 }
  0xc0   :  { %v106_v35 = vclz %v941_v40  ;;  %v734_v43 = vadd.s32 %v733_v38, %v729_v33  ;;  %v264_v45 = vand.u32 31, %v262_v36  ;;  %v94_v54 = vadd.s32 %v1203_v5, %v1209_v11 }
  0xc1   :  { %v263_v55 = vshrl.u32 %v262_v36, 5  ;;  %v298_v15 = vshll.u32 %v258_v49, 8  ;;  %vm40_vm5 = vcmp.lt.s32.totalorder %v1114_v9, 0  ;;  %vm1304_vm11 = vcmp.le.f32.partialorder %v38_v12, 0.7853982 }
  0xc2   :  { %v942_v29 = vadd.s32 4294967294, %v106_v35  ;;  %v735_v47 = vadd.s32 536870912, %v734_v43  ;;  %v265_v51 = vsub.s32 32, %v264_v45  ;;  %v267_v60 = vshll.u32 %v1077_v42, %v264_v45 }
  0xc3   :  { %v270_v63 = vshll.u32 %v1078_v44, %v264_v45  ;;  %v273_v13 = vshll.u32 %v1079_v46, %v264_v45  ;;  %v276_v22 = vshll.u32 %v1080_v48, %v264_v45  ;;  %v279_v17 = vshll.u32 %v1081_v50, %v264_v45 }
  0xc4   :  { %vm943_vm4 = vcmp.lt.s32.totalorder %v942_v29, 0  ;;  %v1267_v59 = vshrl.u32 %v735_v47, 30  ;;  %v268_v62 = vshrl.u32 %v1078_v44, %v265_v51  ;;  %v271_v0 = vshrl.u32 %v1079_v46, %v265_v51 }
  0xc5   :  { %v109_v32 = vsel %vm943_vm4, 0, %v942_v29  ;;  %v274_v5 = vshrl.u32 %v1080_v48, %v265_v51  ;;  %v277_v2 = vshrl.u32 %v1081_v50, %v265_v51  ;;  %v280_v24 = vshrl.u32 %v1082_v58, %v265_v51 }
  0xc6   :  { %v110_v37 = vsub.s32 32, %v109_v32  ;;  %v114_v57 = vsub.s32 4294967266, %v109_v32  ;;  %v111_v61 = vshll.u32 %v102_v7, %v109_v32  ;;  %v737_v4 = vshll.u32 %v1267_v59, 30 }
  0xc7   :  { %v269_v11 = vor.u32 %v268_v62, %v267_v60  ;;  %v272_v6 = vor.u32 %v271_v0, %v270_v63  ;;  %v275_v44 = vor.u32 %v274_v5, %v273_v13  ;;  %v266_v46 = vshrl.u32 %v1077_v42, %v265_v51 }
  0xc8   :  { %v112_v1 = vshrl.u32 %v94_v54, %v110_v37  ;;  %v115_v3 = vadd.s32 127, %v114_v57  ;;  %v1276_v7 = vsub.s32 %v734_v43, %v737_v4  ;;  %vm282_vm6 = vcmp.lt.s32.totalorder %v263_v55, 1 }
  0xc9   :  { %v278_v31 = vor.u32 %v277_v2, %v276_v22  ;;  %v281_v34 = vor.u32 %v280_v24, %v279_v17  ;;  %vm284_vm7 = vcmp.lt.s32.totalorder %v263_v55, 3  ;;  %vm285_vm8 = vcmp.lt.s32.totalorder %v263_v55, 4 }
  0xca   :  { %v113_v16 = vor.u32 %v112_v1, %v111_v61  ;;  %v116_v21 = vshll.u32 %v115_v3, 23  ;;  %v740_v39 = vsub.s32 0, %v1276_v7  ;;  %v290_v33 = vsel %vm282_vm6, %v269_v11, %v272_v6 }
  0xcb   :  { %v287_v36 = vsel %vm285_vm8, %v275_v44, 2102212464  ;;  %v291_v50 = vsel %vm285_vm8, %v278_v31, 920167782  ;;  %v294_v58 = vsel %vm282_vm6, %v272_v6, %v275_v44  ;;  %v295_v38 = vsel %vm285_vm8, %v281_v34, 1326507024 }
  0xcc   :  { %v117_v20 = vor.u32 4788187, %v116_v21  ;;  %v120_v40 = vcvt.s32.f32 %v113_v16  ;;  %v965_v35 = vmin.u32 %v740_v39, %v1276_v7  ;;  %vm283_vm9 = vcmp.lt.s32.totalorder %v263_v55, 2 }
  0xcd   :  { %v292_v42 = vsel %vm284_vm7, %v275_v44, %v291_v50  ;;  %v286_v45 = vsel %vm282_vm6, %v266_v46, %v269_v11  ;;  %v296_v49 = vsel %vm284_vm7, %v278_v31, %v295_v38  ;;  %v124_v51 = vsub.s32 4, %v1240_v56 }
  0xce   :  { %v118_v48 = vand.u32 2147483647, %v117_v20  ;;  %v742_v43 = vclz %v965_v35  ;;  %v293_v47 = vsel %vm283_vm9, %v290_v33, %v292_v42  ;;  %v288_v37 = vsel %vm284_vm7, %v272_v6, %v287_v36 }
  0xcf   :  { %v297_v57 = vsel %vm283_vm9, %v294_v58, %v296_v49  ;;  %v1296_v62 = vmul.u32.u64.low %v298_v15, %v293_v47  ;;  %v1297_v63 = vmul.u32.u64.high %v298_v15, %v293_v47, %v1296_v62  ;;  %v289_v55 = vsel %vm283_vm9, %v286_v45, %v288_v37 }
  0xd0   :  { %v121_v29 = vmul.f32 %v120_v40, %v118_v48  ;;  %v966_v32 = vadd.s32 4294967294, %v742_v43  ;;  %v1293_v60 = vmul.u32.u64.low %v298_v15, %v297_v57  ;;  %v1294_v61 = vmul.u32.u64.high %v298_v15, %v297_v57, %v1293_v60 }
  0xd1   :  { %v534_v4 = vsub.s32 32, %v1262_v41  ;;  %v539_v5 = vadd.s32 127, %v538_v53  ;;  %v125_v11 = vsel %vm40_vm5, %v124_v51, %v1240_v56  ;;  %v308_v12 = vadd.s32 1, %v1297_v63 }
  0xd2   :  { %v122_v54 = vxor.u32 2147483648, %v121_v29  ;;  %vm967_vm10 = vcmp.lt.s32.totalorder %v966_v32, 0  ;;  %vm307_vm12 = vc.u32 %v1294_v61, %v1296_v62  ;;  %v305_v13 = vmul.u32 %v298_v15, %v289_v55 }
  0xd3   :  { %v745_v6 = vsel %vm967_vm10, 0, %v966_v32  ;;  %v518_v16 = vadd.s32 %v1175_v26, %v1172_v25  ;;  %v309_v21 = vsel %vm307_vm12, %v308_v12, %v1297_v63  ;;  %v127_v44 = vsel %vm1304_vm11, 0, %v125_v11 }
  0xd4   :  { %v123_v0 = vsel %vm40_vm5, %v122_v54, %v121_v29  ;;  %v750_v22 = vsub.s32 4294967266, %v745_v6  ;;  %v310_v53 = vadd.s32 %v309_v21, %v305_v13  ;;  %v540_v2 = vshll.u32 %v539_v5, 23 }
  0xd5   :  { %v126_v3 = vsel %vm1304_vm11, %v1114_v9, %v123_v0  ;;  %v536_v56 = vshrl.u32 %v518_v16, %v534_v4  ;;  %v535_v24 = vshll.u32 %v1227_v27, %v1262_v41  ;;  %v234_v20 = vadd.s32 3, %v127_v44 }
  0xd6   :  { %1012 = vcosq.f32 %v126_v3  ;;  %v311_v17 = vadd.s32 536870912, %v310_v53  ;;  %v751_v39 = vadd.s32 127, %v750_v22  ;;  %v541_v40 = vor.u32 4788187, %v540_v2 }
  0xd7   :  { %1014 = vsinq.f32 %v126_v3  ;;  %v537_v15 = vor.u32 %v536_v56, %v535_v24  ;;  %v131_v25 = vand.u32 3, %v127_v44  ;;  %v746_v26 = vsub.s32 32, %v745_v6 }
  0xd8   :  { %v1327_v46 = vshrl.u32 %v311_v17, 30  ;;  %v235_v34 = vand.u32 3, %v234_v20  ;;  %v730_v48 = vadd.s32 %v1248_v23, %v1253_v52  ;;  %v752_v35 = vshll.u32 %v751_v39, 23 }
  0xd9   :  { %v542_v50 = vand.u32 2147483647, %v541_v40  ;;  %v544_v58 = vcvt.s32.f32 %v537_v15  ;;  %vm130_vm13 = vweird.f32 %v1114_v9  ;;  %vm133_vm14 = vcmp.eq.s32.totalorder %v131_v25, 0 }
  0xda   :  { %v313_v31 = vshll.u32 %v1327_v46, 30  ;;  %v748_v41 = vshrl.u32 %v730_v48, %v746_v26  ;;  %vm136_vm15 = vcmp.eq.s32.totalorder %v131_v25, 2  ;;  %v747_v43 = vshll.u32 %v1276_v7, %v745_v6 }
  0xdb   :  { %vm237_vm0 = vcmp.eq.s32.totalorder %v235_v34, 0  ;;  %vm240_vm1 = vcmp.eq.s32.totalorder %v235_v34, 2  ;;  %v753_v45 = vor.u32 4788187, %v752_v35  ;;  %vm132_vm2 = vcmp.lt.s32.totalorder %v131_v25, 2 }
  0xdc   :  { %v314_v33 = vsub.s32 %v310_v53, %v313_v31  ;;  %vm236_vm3 = vcmp.lt.s32.totalorder %v235_v34, 2  ;;  %v749_v54 = vor.u32 %v748_v41, %v747_v43  ;;  %v545_v60 = vmul.f32 %v544_v58, %v542_v50 }
  0xdd   :  { %v754_v0 = vand.u32 2147483647, %v753_v45  ;;  %v306_v11 = vadd.s32 %v1296_v62, %v1294_v61  ;;  %vm464_vm5 = vcmp.lt.s32.totalorder %v1112_v8, 0  ;;  %vm1348_vm6 = vcmp.le.f32.partialorder %v462_v10, 0.7853982 }
  0xde   :  { %v316_v38 = vsub.s32 0, %v314_v33  ;;  %v756_v55 = vcvt.s32.f32 %v749_v54  ;;  %v546_v3 = vxor.u32 2147483648, %v545_v60  ;;  %vm676_vm7 = vcmp.lt.s32.totalorder %v1124_v19, 0 }
  0xdf   :  { %v548_v39 = vsub.s32 4, %v1211_v14  ;;  %vm1361_vm8 = vcmp.le.f32.partialorder %v674_v28, 0.7853982  ;;  %v336_v25 = vsub.s32 4, %v1327_v46  ;;  %vm252_vm9 = vcmp.lt.s32.totalorder %v1128_v30, 0 }
  0xe0   :  { %v949_v23 = vmin.u32 %v316_v38, %v314_v33  ;;  %v757_v5 = vmul.f32 %v756_v55, %v754_v0  ;;  %v547_v9 = vsel %vm464_vm5, %v546_v3, %v545_v60  ;;  %vm251_vm10 = vcmp.le.f32.partialorder %v250_v18, 0.7853982 }
  0xe1   :  { %v550_v61 = vsel %vm1348_vm6, %v1112_v8, %v547_v9  ;;  %v549_v28 = vsel %vm464_vm5, %v548_v39, %v1211_v14  ;;  %v760_v34 = vsub.s32 4, %v1267_v59  ;;  %v337_v48 = vsel %vm252_vm9, %v336_v25, %v1327_v46 }
  0xe2   :  { %v318_v32 = vclz %v949_v23  ;;  %v758_v22 = vxor.u32 2147483648, %v757_v5  ;;  %1016 = vcosq.f32 %v550_v61  ;;  %v551_v35 = vsel %vm1348_vm6, 0, %v549_v28 }
  0xe3   :  { %v1013_v36 = vpop.eup %1012  ;;  %1018 = vsinq.f32 %v550_v61  ;;  %v761_v18 = vsel %vm676_vm7, %v760_v34, %v1267_v59  ;;  %v555_v38 = vand.u32 3, %v551_v35  ;;  %vm342_vm11 = vweird.f32 %v1128_v30 }
  0xe4   :  { %v1015_v27 = vpop.eup %1014  ;;  %v137_v29 = vxor.u32 2147483648, %v1013_v36  ;;  %v950_v1 = vadd.s32 4294967294, %v318_v32  ;;  %v759_v62 = vsel %vm676_vm7, %v758_v22, %v757_v5  ;;  %v763_v50 = vsel %vm1361_vm8, 0, %v761_v18 }
  0xe5   :  { %v134_v42 = vxor.u32 2147483648, %v1015_v27  ;;  %v762_v15 = vsel %vm1361_vm8, %v1124_v19, %v759_v62  ;;  %vm556_vm7 = vcmp.lt.s32.totalorder %v555_v38, 2 }
  0xe6   :  { %v242_v52 = vsel %vm240_vm1, %v137_v29, %v1015_v27  ;;  %v138_v47 = vsel %vm136_vm15, %v137_v29, %v1015_v27  ;;  %vm951_vm4 = vcmp.lt.s32.totalorder %v950_v1, 0  ;;  %1020 = vcosq.f32 %v762_v15 }
  0xe7   :  { %v239_v49 = vsel %vm237_vm0, %v1013_v36, %v134_v42  ;;  %v135_v51 = vsel %vm133_vm14, %v1013_v36, %v134_v42  ;;  %v321_v4 = vsel %vm951_vm4, 0, %v950_v1  ;;  %1022 = vsinq.f32 %v762_v15 }
  0xe8   :  { %v243_v37 = vsel %vm236_vm3, %v239_v49, %v242_v52  ;;  %v139_v57 = vsel %vm132_vm2, %v135_v51, %v138_v47  ;;  %v322_v6 = vsub.s32 32, %v321_v4  ;;  %v326_v12 = vsub.s32 4294967266, %v321_v4 }
  0xe9   :  { %v244_v7 = vsel %vm130_vm13, nan, %v243_v37  ;;  %v1339_v63 = vsel %vm130_vm13, nan, %v139_v57  ;;  %v323_v13 = vshll.u32 %v314_v33, %v321_v4  ;;  %v339_v33 = vsel %vm251_vm10, 0, %v337_v48 }
  0xea   :  { %882 = vrot.lane.b32.xlu1 %v244_v7, %s1083_s0  ;;  %v324_v16 = vshrl.u32 %v306_v11, %v322_v6  ;;  %v327_v21 = vadd.s32 127, %v326_v12  ;;  %v658_v36 = vadd.s32 3, %v551_v35  ;;  %v446_v14 = vadd.s32 3, %v339_v33 }
  0xeb   :  { %v343_v46 = vand.u32 3, %v339_v33  ;;  %v870_v29 = vadd.s32 3, %v763_v50  ;;  %vm557_vm14 = vcmp.eq.s32.totalorder %v555_v38, 0  ;;  %vm560_vm15 = vcmp.eq.s32.totalorder %v555_v38, 2 }
  0xec   :  { %v325_v53 = vor.u32 %v324_v16, %v323_v13  ;;  %v328_v44 = vshll.u32 %v327_v21, 23  ;;  %v659_v41 = vand.u32 3, %v658_v36  ;;  %v447_v43 = vand.u32 3, %v446_v14 }
  0xed   :  { %vm344_vm0 = vcmp.lt.s32.totalorder %v343_v46, 2  ;;  %vm345_vm1 = vcmp.eq.s32.totalorder %v343_v46, 0  ;;  %v871_v47 = vand.u32 3, %v870_v29  ;;  %v767_v49 = vand.u32 3, %v763_v50 }
  0xee   :  { %v329_v56 = vor.u32 4788187, %v328_v44  ;;  %v332_v24 = vcvt.s32.f32 %v325_v53  ;;  %vm661_vm12 = vcmp.eq.s32.totalorder %v659_v41, 0  ;;  %vm664_vm13 = vcmp.eq.s32.totalorder %v659_v41, 2 }
  0xef   :  { %v1017_v58 = vpop.eup %1016  ;;  %vm448_vm2 = vcmp.lt.s32.totalorder %v447_v43, 2  ;;  %vm449_vm3 = vcmp.eq.s32.totalorder %v447_v43, 0  ;;  %vm452_vm4 = vcmp.eq.s32.totalorder %v447_v43, 2  ;;  %vm348_vm5 = vcmp.eq.s32.totalorder %v343_v46, 2 }
  0xf0   :  { %v330_v17 = vand.u32 2147483647, %v329_v56  ;;  %v1019_v27 = vpop.eup %1018  ;;  %v561_v23 = vxor.u32 2147483648, %v1017_v58  ;;  %vm660_vm6 = vcmp.lt.s32.totalorder %v659_v41, 2  ;;  %vm873_vm8 = vcmp.eq.s32.totalorder %v871_v47, 0 }
  0xf1   :  { %v558_v45 = vxor.u32 2147483648, %v1019_v27 }
  0xf2   :  { %v333_v20 = vmul.f32 %v332_v24, %v330_v17  ;;  %v666_v57 = vsel %vm664_vm13, %v561_v23, %v1019_v27  ;;  %v562_v1 = vsel %vm560_vm15, %v561_v23, %v1019_v27  ;;  %vm554_vm13 = vweird.f32 %v1112_v8 }
  0xf3   :  { %v1021_v42 = vpop.eup %1020  ;;  %v663_v37 = vsel %vm661_vm12, %v1017_v58, %v558_v45  ;;  %v559_v0 = vsel %vm557_vm14, %v1017_v58, %v558_v45  ;;  %vm772_vm12 = vcmp.eq.s32.totalorder %v767_v49, 2  ;;  %vm872_vm14 = vcmp.lt.s32.totalorder %v871_v47, 2 }
  0xf4   :  { %v334_v40 = vxor.u32 2147483648, %v333_v20  ;;  %v1023_v52 = vpop.eup %1022  ;;  %v773_v5 = vxor.u32 2147483648, %v1021_v42  ;;  %v667_v16 = vsel %vm660_vm6, %v663_v37, %v666_v57  ;;  %v563_v21 = vsel %vm556_vm7, %v559_v0, %v562_v1 }
  0xf5   :  { %v770_v4 = vxor.u32 2147483648, %v1023_v52  ;;  %v668_v56 = vsel %vm554_vm13, nan, %v667_v16  ;;  %v564_v2 = vsel %vm554_vm13, nan, %v563_v21  ;;  %vm766_vm15 = vweird.f32 %v1124_v19 }
  0xf6   :  { %v335_v26 = vsel %vm252_vm9, %v334_v40, %v333_v20  ;;  %vm769_vm9 = vcmp.eq.s32.totalorder %v767_v49, 0  ;;  %v774_v44 = vsel %vm772_vm12, %v773_v5, %v1023_v52  ;;  %vm921_vm6 = vcmask 916480  }
  0xf7   :  { %v338_v31 = vsel %vm251_vm10, %v1128_v30, %v335_v26  ;;  %vm876_vm10 = vcmp.eq.s32.totalorder %v871_v47, 2  ;;  %v875_v9 = vsel %vm873_vm8, %v1021_v42, %v770_v4  ;;  %v771_v53 = vsel %vm769_vm9, %v1021_v42, %v770_v4 }
  0xf8   :  { %1024 = vcosq.f32 %v338_v31  ;;  %v878_v22 = vsel %vm876_vm10, %v773_v5, %v1023_v52 }
  0xf9   :  { %1026 = vsinq.f32 %v338_v31  ;;  %v879_v30 = vsel %vm872_vm14, %v875_v9, %v878_v22 }
  0xfa   :  { %v880_v62 = vsel %vm766_vm15, nan, %v879_v30 }
 0x105   :  { %v1025_v59 = vpop.eup %1024 }
 0x106   :  { %v1027_v51 = vpop.eup %1026  ;;  %v349_v54 = vxor.u32 2147483648, %v1025_v59 }
 0x107   :  { %v346_v32 = vxor.u32 2147483648, %v1027_v51 }
 0x108   :  { %v454_v60 = vsel %vm452_vm4, %v349_v54, %v1027_v51  ;;  %v350_v7 = vsel %vm348_vm5, %v349_v54, %v1027_v51  ;;  %vm917_vm4 = vcmask 654336   ;;  %vm919_vm5 = vcmask 785408  }
 0x109   :  { %v451_v55 = vsel %vm449_vm3, %v1025_v59, %v346_v32  ;;  %v347_v3 = vsel %vm345_vm1, %v1025_v59, %v346_v32  ;;  %vm911_vm1 = vcmask 261120   ;;  %vm915_vm3 = vcmask 523264  }
 0x10a   :  { %v455_v11 = vsel %vm448_vm2, %v451_v55, %v454_v60  ;;  %v351_v6 = vsel %vm344_vm0, %v347_v3, %v350_v7  ;;  %vm909_vm0 = vcmask 130048   ;;  %vm913_vm2 = vcmask 392192  }
 0x10b   :  { %v456_v12 = vsel %vm342_vm11, nan, %v455_v11  ;;  %v352_v13 = vsel %vm342_vm11, nan, %v351_v6  ;;  %vm768_vm11 = vcmp.lt.s32.totalorder %v767_v49, 2 }
 0x10c   :  { %890 = vrot.lane.b32.xlu1 %v456_v12, %s1084_s1  ;;  %886 = vrot.lane.b32.xlu0 %v352_v13, %s1085_s16  ;;  %v775_v61 = vsel %vm768_vm11, %v771_v53, %v774_v44 }
 0x10d   :  { %v776_v17 = vsel %vm766_vm15, nan, %v775_v61 }
 0x110   :  { %898 = vrot.lane.b32.xlu1 %v668_v56, %s1086_s17  ;;  %894 = vrot.lane.b32.xlu0 %v564_v2, %s1087_s18 }
 0x114   :  { %906 = vrot.lane.b32.xlu1 %v880_v62, %s1088_s19  ;;  %902 = vrot.lane.b32.xlu0 %v776_v17, %s1089_s20 }
 0x15c   :  { %v883_v24 = vpop.permute.xlu1 %882 }
 0x15d   :  { %v910_v8 = vsel %vm909_vm0, %v1339_v63, %v883_v24 }
 0x17e   :  { %v891_v20 = vpop.permute.xlu1 %890  ;;  %v887_v39 = vpop.permute.xlu0 %886 }
 0x17f   :  { %v912_v10 = vsel %vm911_vm1, %v910_v8, %v887_v39 }
 0x180   :  { %v914_v40 = vsel %vm913_vm2, %v912_v10, %v891_v20 }
 0x182   :  { %v899_v15 = vpop.permute.xlu1 %898  ;;  %v895_v25 = vpop.permute.xlu0 %894 }
 0x183   :  { %v916_v19 = vsel %vm915_vm3, %v914_v40, %v895_v25 }
 0x184   :  { %v918_v28 = vsel %vm917_vm4, %v916_v19, %v899_v15 }
 0x186   :  { %v907_v26 = vpop.permute.xlu1 %906  ;;  %v903_v31 = vpop.permute.xlu0 %902 }
 0x187   :  { %v920_v34 = vsel %vm919_vm5, %v918_v28, %v903_v31 }
 0x188   :  { %v922_v63 = vsel %vm921_vm6, %v920_v34, %v907_v26 }
 0x189   :  { %923 = vst [vmem:[#allocation5] sm:$0x3] %v922_v63 }
 0x18a   :  { %1059 = shalt.err (!%p1056_p9)
}
 0x18b   :  { %933 = dma.vmem_to_hbm [thread:$0]  %s931_s22, 32, %s1404_s2, [#allocation4]  }
 0x18c   :  { %1070 = dma.done.wait [#allocation4], 32  }
 0x18d   :  { %1071 = vsyncadd [#allocation4], 4294967264 }
 0x18e   :  { %937 = vsyncpa [#allocation3], 1 }
 0x18f   :  { %938 = vsyncpa [#allocation4], 1 }

</bundles_post_ra>
